<compile_context>
chip_gen: v7x
topology: tpu7x:2x2x1
jax: 0.10.0
libtpu: 0.0.40
codegen_flags: <defaults>
</compile_context>

<pallas_src>
import functools

import jax
import jax.numpy as jnp
from jax.experimental import pallas as pl
from jax.experimental.pallas import tpu as pltpu

D_IN, D_HID, D_OUT = 320, 50, 10


def _log_softmax_rows(z):
    """Numerically stable log_softmax over the last axis (dim=1)."""
    m = jnp.max(z, axis=-1, keepdims=True)
    shifted = z - m
    lse = jnp.log(jnp.sum(jnp.exp(shifted), axis=-1, keepdims=True))
    return shifted - lse


def net_kernel(x_ref, w1_ref, b1_ref, w2_ref, b2_ref, o_ref):
    # fc1: (TB, 320) @ (320, 50) + (1, 50), then log_softmax(dim=1)
    h = jnp.dot(x_ref[...], w1_ref[...], preferred_element_type=jnp.float32)
    h = h + b1_ref[...]
    h = _log_softmax_rows(h)

    # fc2: (TB, 50) @ (50, 10) + (1, 10), then log_softmax(dim=1)
    z = jnp.dot(h, w2_ref[...], preferred_element_type=jnp.float32)
    z = z + b2_ref[...]
    z = _log_softmax_rows(z)

    o_ref[...] = z.astype(o_ref.dtype)


def _pick_block_b(b):
    """Fixed bucket set -> at most 3 distinct Mosaic compiles, ever.

    - tiny batches: one 8-row tile (minimum sublane multiple).
    - mid batches (<= 2048): 512-row tiles, so the grid has >= 2 steps for
      anything above 512 rows (both v7x TensorCores get work).
    - large batches: 2048-row tiles to amortize the ~0.35 us per-grid-step
      overhead against the per-tile x DMA.
    """
    if b <= 8:
        return 8
    if b <= 2048:
        return 512
    return 2048


@functools.partial(jax.jit, static_argnames=("block_b",))
def _net_forward(x, w1, b1, w2, b2, *, block_b):
    b = x.shape[0]
    grid = (pl.cdiv(b, block_b),)
    cost = pl.CostEstimate(
        flops=2 * b * (D_IN * D_HID + D_HID * D_OUT),
        transcendentals=b * (D_HID + D_OUT),
        bytes_accessed=b * (D_IN + D_OUT) * 4
        + (D_IN * D_HID + D_HID + D_HID * D_OUT + D_OUT) * 4,
    )
    return pl.pallas_call(
        net_kernel,
        out_shape=jax.ShapeDtypeStruct((b, D_OUT), jnp.float32),
        grid=grid,
        in_specs=[
            # x: one (TB, 320) tile per grid step — pipelined DMA. The final
            # partial block (when TB does not divide B) is handled by Pallas:
            # rows past the end are garbage but every row is independent, and
            # their output rows are masked on writeback.
            pl.BlockSpec((block_b, D_IN), lambda i: (i, 0)),
            # weights/biases: resident across all grid steps (constant index).
            pl.BlockSpec((D_IN, D_HID), lambda i: (0, 0)),
            pl.BlockSpec((1, D_HID), lambda i: (0, 0)),
            pl.BlockSpec((D_HID, D_OUT), lambda i: (0, 0)),
            pl.BlockSpec((1, D_OUT), lambda i: (0, 0)),
        ],
        out_specs=pl.BlockSpec((block_b, D_OUT), lambda i: (i, 0)),
        compiler_params=pltpu.CompilerParams(
            dimension_semantics=("parallel",),
        ),
        cost_estimate=cost,
    )(x, w1, b1, w2, b2)


def net_forward(x, w1, b1, w2, b2):
    return _net_forward(x, w1, b1, w2, b2, block_b=_pick_block_b(x.shape[0]))


class Net:
    """JAX/Pallas counterpart of the PyTorch Net module."""

    def __init__(self, key):
        k1, k2, k3, k4 = jax.random.split(key, 4)
        # Deterministic synthetic init (Linear(320, 50), Linear(50, 10)).
        # Stored as (in, out) so the kernel does x @ W + b.
        self.w1 = jax.random.normal(k1, (D_IN, D_HID), jnp.float32) * 0.05
        self.b1 = jax.random.normal(k2, (1, D_HID), jnp.float32) * 0.05
        self.w2 = jax.random.normal(k3, (D_HID, D_OUT), jnp.float32) * 0.05
        self.b2 = jax.random.normal(k4, (1, D_OUT), jnp.float32) * 0.05
        # Non-trainable bool flag, toggled on every forward (host-side state,
        # mirrors torch.logical_not on the ParameterList entry).
        self.flag = jnp.zeros((1,), dtype=jnp.bool_)

    def __call__(self, x):
        out = net_forward(x, self.w1, self.b1, self.w2, self.b2)
        # Side effects from the PyTorch forward (flag toggle + prints) are
        # host-side glue, not kernel compute.
        self.flag = jnp.logical_not(self.flag)
        print(self.flag)
        print(out.shape)
        return out


if __name__ == "__main__":
    key = jax.random.PRNGKey(0)
    net_key, x_key = jax.random.split(key)
    net = Net(net_key)

    batch = 8
    x = jax.random.normal(x_key, (batch, D_IN), jnp.float32)

    out = net(x)
    jax.block_until_ready(out)

    assert out.shape == (batch, D_OUT)
    # Rows of log_softmax output must exp-sum to 1.
    row_sums = jnp.sum(jnp.exp(out), axis=1)
    assert jnp.allclose(row_sums, jnp.ones((batch,)), atol=1e-4)

    # Reference check against plain JAX.
    ref_h = jax.nn.log_softmax(x @ net.w1 + net.b1, axis=1)
    ref = jax.nn.log_softmax(ref_h @ net.w2 + net.b2, axis=1)
    assert jnp.allclose(out, ref, atol=1e-5, rtol=1e-5)

    # Exercise a batch that is not a multiple of the tile (partial final
    # block handled by Pallas — no wrapper-side pad/slice copies).
    x_big = jax.random.normal(x_key, (523, D_IN), jnp.float32)
    out_big = net(x_big)
    jax.block_until_ready(out_big)
    assert out_big.shape == (523, D_OUT)
    ref_big = jax.nn.log_softmax(
        jax.nn.log_softmax(x_big @ net.w1 + net.b1, axis=1) @ net.w2 + net.b2,
        axis=1,
    )
    assert jnp.allclose(out_big, ref_big, atol=1e-5, rtol=1e-5)
    assert jnp.all(jnp.isfinite(out_big))

    print("KERNEL_OK")
</pallas_src>

<mosaic_0001>
module attributes {stable_mosaic.version = 11 : i64} {
  func.func @net_kernel(%arg0: i32, %arg1: memref<8x320xf32, #tpu.memory_space<vmem>>, %arg2: memref<320x50xf32, #tpu.memory_space<vmem>>, %arg3: memref<1x50xf32, #tpu.memory_space<vmem>>, %arg4: memref<50x10xf32, #tpu.memory_space<vmem>>, %arg5: memref<1x10xf32, #tpu.memory_space<vmem>>, %arg6: memref<8x10xf32, #tpu.memory_space<vmem>>) attributes {dimension_semantics = [#tpu.dimension_semantics<parallel>], iteration_bounds = array<i64: 1>, scalar_prefetch = 0 : i64, scratch_operands = 0 : i64, tpu.core_type = #tpu.core_type<tc>, window_params = [{transform_indices = @transform_0, window_bounds = array<i64: 8, 320>}, {pipeline_mode = #tpu.pipeline_mode<synchronous>, transform_indices = @transform_1, window_bounds = array<i64: 320, 50>}, {pipeline_mode = #tpu.pipeline_mode<synchronous>, transform_indices = @transform_2, window_bounds = array<i64: 1, 50>}, {pipeline_mode = #tpu.pipeline_mode<synchronous>, transform_indices = @transform_3, window_bounds = array<i64: 50, 10>}, {pipeline_mode = #tpu.pipeline_mode<synchronous>, transform_indices = @transform_4, window_bounds = array<i64: 1, 10>}, {transform_indices = @transform_5, window_bounds = array<i64: 8, 10>}]} {
    %c0 = arith.constant 0 : index
    %c0_0 = arith.constant 0 : index
    %0 = vector.load %arg1[%c0, %c0_0] : memref<8x320xf32, #tpu.memory_space<vmem>>, vector<8x320xf32>
    %c0_1 = arith.constant 0 : index
    %c0_2 = arith.constant 0 : index
    %1 = vector.load %arg2[%c0_1, %c0_2] : memref<320x50xf32, #tpu.memory_space<vmem>>, vector<320x50xf32>
    %cst = arith.constant dense<0.000000e+00> : vector<8x50xf32>
    %2 = tpu.matmul %0, %1, %cst {dimension_numbers = #tpu.dot_dimension_numbers<[1], [0], [0], [1], [0, 0, 1, 1], [], []>} : vector<8x320xf32>, vector<320x50xf32>, vector<8x50xf32> -> vector<8x50xf32>
    %c0_3 = arith.constant 0 : index
    %c0_4 = arith.constant 0 : index
    %3 = vector.load %arg3[%c0_3, %c0_4] : memref<1x50xf32, #tpu.memory_space<vmem>>, vector<1x50xf32>
    %4 = vector.broadcast %3 : vector<1x50xf32> to vector<8x50xf32>
    %5 = arith.addf %2, %4 : vector<8x50xf32>
    %cst_5 = arith.constant dense<0xFF800000> : vector<8xf32>
    %6 = vector.multi_reduction <maximumf>, %5, %cst_5 [1] : vector<8x50xf32> to vector<8xf32>
    %7 = vector.shape_cast %6 : vector<8xf32> to vector<8x1xf32>
    %8 = vector.broadcast %7 : vector<8x1xf32> to vector<8x50xf32>
    %9 = arith.subf %5, %8 : vector<8x50xf32>
    %10 = math.exp %9 : vector<8x50xf32>
    %cst_6 = arith.constant dense<0.000000e+00> : vector<8xf32>
    %11 = vector.multi_reduction <add>, %10, %cst_6 [1] : vector<8x50xf32> to vector<8xf32>
    %12 = vector.shape_cast %11 : vector<8xf32> to vector<8x1xf32>
    %13 = math.log %12 : vector<8x1xf32>
    %14 = vector.broadcast %13 : vector<8x1xf32> to vector<8x50xf32>
    %15 = arith.subf %9, %14 : vector<8x50xf32>
    %c0_7 = arith.constant 0 : index
    %c0_8 = arith.constant 0 : index
    %16 = vector.load %arg4[%c0_7, %c0_8] : memref<50x10xf32, #tpu.memory_space<vmem>>, vector<50x10xf32>
    %cst_9 = arith.constant dense<0.000000e+00> : vector<8x10xf32>
    %17 = tpu.matmul %15, %16, %cst_9 {dimension_numbers = #tpu.dot_dimension_numbers<[1], [0], [0], [1], [0, 0, 1, 1], [], []>} : vector<8x50xf32>, vector<50x10xf32>, vector<8x10xf32> -> vector<8x10xf32>
    %c0_10 = arith.constant 0 : index
    %c0_11 = arith.constant 0 : index
    %18 = vector.load %arg5[%c0_10, %c0_11] : memref<1x10xf32, #tpu.memory_space<vmem>>, vector<1x10xf32>
    %19 = vector.broadcast %18 : vector<1x10xf32> to vector<8x10xf32>
    %20 = arith.addf %17, %19 : vector<8x10xf32>
    %cst_12 = arith.constant dense<0xFF800000> : vector<8xf32>
    %21 = vector.multi_reduction <maximumf>, %20, %cst_12 [1] : vector<8x10xf32> to vector<8xf32>
    %22 = vector.shape_cast %21 : vector<8xf32> to vector<8x1xf32>
    %23 = vector.broadcast %22 : vector<8x1xf32> to vector<8x10xf32>
    %24 = arith.subf %20, %23 : vector<8x10xf32>
    %25 = math.exp %24 : vector<8x10xf32>
    %cst_13 = arith.constant dense<0.000000e+00> : vector<8xf32>
    %26 = vector.multi_reduction <add>, %25, %cst_13 [1] : vector<8x10xf32> to vector<8xf32>
    %27 = vector.shape_cast %26 : vector<8xf32> to vector<8x1xf32>
    %28 = math.log %27 : vector<8x1xf32>
    %29 = vector.broadcast %28 : vector<8x1xf32> to vector<8x10xf32>
    %30 = arith.subf %24, %29 : vector<8x10xf32>
    %c0_14 = arith.constant 0 : index
    %c0_15 = arith.constant 0 : index
    %31 = vector.load %arg6[%c0_14, %c0_15] : memref<8x10xf32, #tpu.memory_space<vmem>>, vector<8x10xf32>
    tpu.vector_store %arg6[%c0_14, %c0_15], %30 {strides = array<i32>} : memref<8x10xf32, #tpu.memory_space<vmem>>, vector<8x10xf32>,
    return
  }
  func.func @transform_0(%arg0: i32) -> (i32, i32) {
    %c0_i32 = arith.constant 0 : i32
    %c0_i32_0 = arith.constant 0 : i32
    return %arg0, %c0_i32 : i32, i32
  }
  func.func @transform_1(%arg0: i32) -> (i32, i32) {
    %c0_i32 = arith.constant 0 : i32
    %c0_i32_0 = arith.constant 0 : i32
    %c0_i32_1 = arith.constant 0 : i32
    return %c0_i32, %c0_i32_0 : i32, i32
  }
  func.func @transform_2(%arg0: i32) -> (i32, i32) {
    %c0_i32 = arith.constant 0 : i32
    %c0_i32_0 = arith.constant 0 : i32
    %c0_i32_1 = arith.constant 0 : i32
    return %c0_i32, %c0_i32_0 : i32, i32
  }
  func.func @transform_3(%arg0: i32) -> (i32, i32) {
    %c0_i32 = arith.constant 0 : i32
    %c0_i32_0 = arith.constant 0 : i32
    %c0_i32_1 = arith.constant 0 : i32
    return %c0_i32, %c0_i32_0 : i32, i32
  }
  func.func @transform_4(%arg0: i32) -> (i32, i32) {
    %c0_i32 = arith.constant 0 : i32
    %c0_i32_0 = arith.constant 0 : i32
    %c0_i32_1 = arith.constant 0 : i32
    return %c0_i32, %c0_i32_0 : i32, i32
  }
  func.func @transform_5(%arg0: i32) -> (i32, i32) {
    %c0_i32 = arith.constant 0 : i32
    %c0_i32_0 = arith.constant 0 : i32
    return %arg0, %c0_i32 : i32, i32
  }
}

</mosaic_0001>

<bundles_post_ra>
// kernel: _net_forward.1
= control target key start
LH: loop header
LB: loop body
LE: loop exit
PB: predicated region body
PF: predicated region fallthrough
CT: control target
= control target key end

     0   :  { %v529_v7 = vmov 0.0|0.0   ;;  %vm530_vm0 = vmmov 0   ;;  %v531_v8 = vmov 0.0   ;;  %s749_s0 = inlined_call_operand.vmem [shape: f32[8,320], index: 0, kind: input, shape index: {}]   ;;  %s750_s1 = inlined_call_operand.vmem [shape: f32[320,50], index: 1, kind: input, shape index: {}]   ;;  %s751_s2 = inlined_call_operand.vmem [shape: f32[1,50], index: 2, kind: input, shape index: {}]   ;;  %s752_s3 = inlined_call_operand.vmem [shape: f32[50,10], index: 3, kind: input, shape index: {}]   ;;  %s753_s4 = inlined_call_operand.vmem [shape: f32[1,10], index: 4, kind: input, shape index: {}]   ;;  %s754_s5 = inlined_call_operand.hbm [shape: f32[8,10], index: 5, kind: output, shape index: {}]  }
   0x1   :  { %v40_v0 = vld [vmem:[%s750_s1 + $0x80] sm:$0xff]  ;;  %v41_v1 = vld [vmem:[%s750_s1 + $0x88] sm:$0xff]  ;;  %v42_v5 = vld [vmem:[%s750_s1 + $0x90] sm:$0xff]  ;;  %472 = vmatprep.subr.bf16.mxu1 %v529_v7  ;;  %420 = vmatprep.mubr.msk.f32.mxu1 %vm530_vm0, %v531_v8 }
   0x2   :  { %v24_v2 = vld [vmem:[%s750_s1] sm:$0xff]  ;;  %v440_v3 = vpack.c.bf16 %v41_v1, %v40_v0  ;;  %v25_v4 = vld [vmem:[%s750_s1 + $0x8] sm:$0xff]  ;;  %v43_v6 = vld [vmem:[%s750_s1 + $0x98] sm:$0xff] }
   0x3   :  { %v442_v9 = vpack.c.bf16 %v25_v4, %v24_v2  ;;  %v444_v10 = vpack.c.bf16 %v43_v6, %v42_v5  ;;  %v26_v11 = vld [vmem:[%s750_s1 + $0x10] sm:$0xff]  ;;  %v27_v12 = vld [vmem:[%s750_s1 + $0x18] sm:$0xff]  ;;  %v44_v13 = vld [vmem:[%s750_s1 + $0xa0] sm:$0xff] }
   0x4   :  { %441 = vmatprep.subr.bf16.mxu0 %v440_v3  ;;  %v45_v14 = vld [vmem:[%s750_s1 + $0xa8] sm:$0xff]  ;;  %v446_v15 = vpack.c.bf16 %v27_v12, %v26_v11  ;;  %v28_v17 = vld [vmem:[%s750_s1 + $0x20] sm:$0xff]  ;;  %v46_v19 = vld [vmem:[%s750_s1 + $0xb0] sm:$0xff] }
   0x5   :  { %443 = vmatpush3.bf16.msra.mxu0 %v442_v9  ;;  %v448_v16 = vpack.c.bf16 %v45_v14, %v44_v13  ;;  %v29_v18 = vld [vmem:[%s750_s1 + $0x28] sm:$0xff]  ;;  %v47_v20 = vld [vmem:[%s750_s1 + $0xb8] sm:$0xff]  ;;  %v56_v22 = vld [vmem:[%s750_s1 + $0x100] sm:$0xff] }
   0x6   :  { %445 = vmatprep.subr.bf16.mxu0 %v444_v10  ;;  %v450_v21 = vpack.c.bf16 %v29_v18, %v28_v17  ;;  %v57_v23 = vld [vmem:[%s750_s1 + $0x108] sm:$0xff]  ;;  %v452_v24 = vpack.c.bf16 %v47_v20, %v46_v19  ;;  %v30_v25 = vld [vmem:[%s750_s1 + $0x30] sm:$0xff]  ;;  %v31_v26 = vld [vmem:[%s750_s1 + $0x38] sm:$0xff] }
   0x7   :  { %v48_v27 = vld [vmem:[%s750_s1 + $0xc0] sm:$0xff]  ;;  %v473_v28 = vpack.c.bf16 %v57_v23, %v56_v22  ;;  %v49_v29 = vld [vmem:[%s750_s1 + $0xc8] sm:$0xff]  ;;  %v58_v30 = vld [vmem:[%s750_s1 + $0x110] sm:$0xff]  ;;  %v454_v33 = vpack.c.bf16 %v31_v26, %v30_v25 }
   0x8   :  { %v59_v31 = vld [vmem:[%s750_s1 + $0x118] sm:$0xff]  ;;  %v60_v34 = vld [vmem:[%s750_s1 + $0x120] sm:$0xff]  ;;  %v61_v35 = vld [vmem:[%s750_s1 + $0x128] sm:$0xff]  ;;  %v456_v37 = vpack.c.bf16 %v49_v29, %v48_v27 }
   0x9   :  { %447 = vmatpush3.bf16.msra.mxu0 %v446_v15  ;;  %474 = vmatpush3.bf16.msra.mxu1 %v473_v28  ;;  %v476_v32 = vpack.c.bf16 %v59_v31, %v58_v30  ;;  %v22_v36 = vld [vmem:[%s749_s0 + $0x8] sm:$0xff]  ;;  %v32_v38 = vld [vmem:[%s750_s1 + $0x40] sm:$0xff]  ;;  %v50_v40 = vld [vmem:[%s750_s1 + $0xd0] sm:$0xff] }
   0xa   :  { %449 = vmatprep.subr.bf16.mxu0 %v448_v16  ;;  %475 = vmatprep.subr.bf16.mxu1 %v529_v7  ;;  %v33_v39 = vld [vmem:[%s750_s1 + $0x48] sm:$0xff]  ;;  %v51_v41 = vld [vmem:[%s750_s1 + $0xd8] sm:$0xff] }
   0xb   :  { %139 = vmatprep.mubr.f32.mxu0 %v22_v36 }
   0xd   :  { %451 = vmatpush3.bf16.msra.mxu0 %v450_v21 }
   0xe   :  { %453 = vmatprep.subr.bf16.mxu0 %v452_v24 }
   0xf   :  { %10 = vsyncpa [#allocation3], 0  ;;  %477 = vmatpush3.bf16.msra.mxu1 %v476_v32  ;;  %v479_v42 = vpack.c.bf16 %v61_v35, %v60_v34  ;;  %v458_v43 = vpack.c.bf16 %v33_v39, %v32_v38  ;;  %v62_v44 = vld [vmem:[%s750_s1 + $0x130] sm:$0xff]  ;;  %v63_v45 = vld [vmem:[%s750_s1 + $0x138] sm:$0xff]  ;;  %v460_v46 = vpack.c.bf16 %v51_v41, %v50_v40  ;;  %vm71_vm1 = vcmask 523264  }
  0x10   :  { %478 = vmatprep.subr.bf16.mxu1 %v529_v7  ;;  %v34_v47 = vld [vmem:[%s750_s1 + $0x50] sm:$0xff]  ;;  %v35_v48 = vld [vmem:[%s750_s1 + $0x58] sm:$0xff]  ;;  %v52_v49 = vld [vmem:[%s750_s1 + $0xe0] sm:$0xff]  ;;  %v482_v51 = vpack.c.bf16 %v63_v45, %v62_v44  ;;  %vm215_vm2 = vcmask 408576   ;;  %vm245_vm3 = vcmask 1041408   ;;  %vm319_vm4 = vcmask 80896  }
  0x11   :  { %455 = vmatpush3.bf16.msra.mxu0 %v454_v33  ;;  %v53_v50 = vld [vmem:[%s750_s1 + $0xe8] sm:$0xff]  ;;  %v462_v52 = vpack.c.bf16 %v35_v48, %v34_v47  ;;  %v36_v54 = vld [vmem:[%s750_s1 + $0x60] sm:$0xff]  ;;  %v54_v56 = vld [vmem:[%s750_s1 + $0xf0] sm:$0xff] }
  0x12   :  { %457 = vmatprep.subr.bf16.mxu0 %v456_v37  ;;  %v464_v53 = vpack.c.bf16 %v53_v50, %v52_v49  ;;  %v37_v55 = vld [vmem:[%s750_s1 + $0x68] sm:$0xff]  ;;  %v55_v57 = vld [vmem:[%s750_s1 + $0xf8] sm:$0xff]  ;;  %v23_v58 = vld [vmem:[%s749_s0 + $0x10] sm:$0xff] }
  0x13   :  { %480 = vmatpush3.bf16.msra.mxu1 %v479_v42  ;;  %v466_v59 = vpack.c.bf16 %v37_v55, %v36_v54  ;;  %v468_v60 = vpack.c.bf16 %v55_v57, %v54_v56  ;;  %v38_v61 = vld [vmem:[%s750_s1 + $0x70] sm:$0xff]  ;;  %v39_v62 = vld [vmem:[%s750_s1 + $0x78] sm:$0xff]  ;;  %v21_v0 = vld [vmem:[%s749_s0] sm:$0xff] }
  0x14   :  { %481 = vmatprep.subr.bf16.mxu1 %v529_v7  ;;  %v470_v63 = vpack.c.bf16 %v39_v62, %v38_v61  ;;  %v347_v5 = vld [vmem:[%s751_s2] ss:$0 sm:$0xff]  ;;  %v229_v18 = vld [vmem:[%s752_s3 + $0x8] sm:$0xff]  ;;  %v230_v20 = vld [vmem:[%s752_s3 + $0x10] sm:$0xff] }
  0x15   :  { %459 = vmatpush3.bf16.msra.mxu0 %v458_v43  ;;  %v228_v17 = vld [vmem:[%s752_s3] sm:$0xff]  ;;  %v231_v21 = vld [vmem:[%s752_s3 + $0x18] sm:$0xff]  ;;  %v233_v24 = vld [vmem:[%s752_s3 + $0x28] sm:$0xff] }
  0x16   :  { %461 = vmatprep.subr.bf16.mxu0 %v460_v46  ;;  %v485_v19 = vpack.c.bf16 %v229_v18, %v228_v17  ;;  %v488_v22 = vpack.c.bf16 %v231_v21, %v230_v20  ;;  %v232_v23 = vld [vmem:[%s752_s3 + $0x20] sm:$0xff]  ;;  %v234_v26 = vld [vmem:[%s752_s3 + $0x30] sm:$0x3]  ;;  %s532_s3 = smov [#allocation2]  }
  0x17   :  { %483 = vmatpush3.bf16.msra.mxu1 %v482_v51  ;;  %v491_v25 = vpack.c.bf16 %v233_v24, %v232_v23  ;;  %v349_v30 = vld [vmem:[%s753_s4] ss:$0 sm:$0xff]  ;;  %s339_s4 = sshll.u32 %s532_s3, 4  ;;  %s340_s4 = int_to_ptr.vmem [resolvable:$true] %s339_s4 }
  0x18   :  { %484 = vmatprep.subr.bf16.mxu1 %v529_v7  ;;  %s505_s19 = scalar_lea.vmem %s340_s4, 128  ;;  %p510_p1 = scmp.lt.s32.totalorder %s340_s4, %s340_s4 }
  0x19   :  { %463 = vmatpush3.bf16.msra.mxu0 %v462_v52  ;;  %p506_p0 = scmp.ne.s32.totalorder %s340_s4, %s505_s19  ;;  %p511_p2 = scmp.lt.s32.totalorder %s505_s19, %s505_s19 }
  0x1a   :  { %465 = vmatprep.subr.bf16.mxu0 %v464_v53  ;;  %421 = vmatmul.mubr.msk.f32.vlgmr.msra.gmra.mrb[0].mxu1 %vm71_vm1, %v23_v58 }
  0x1b   :  { %437 = vmatprep.mubr.msk.f32.mxu1 %vm530_vm0, %v531_v8  ;;  %486 = vmatpush3.bf16.msra.mxu1 %v485_v19  ;;  %p512_p3 = por %p511_p2, %p510_p1 }
  0x1c   :  { %487 = vmatprep.subr.bf16.mxu1 %v529_v7 }
  0x1d   :  { %467 = vmatpush3.bf16.msra.mxu0 %v466_v59  ;;  %p513_p4 = pnand %p512_p3, %p506_p0 }
  0x1e   :  { %469 = vmatprep.subr.bf16.mxu0 %v468_v60 }
  0x1f   :  { %489 = vmatpush3.bf16.msra.mxu1 %v488_v22 }
  0x20   :  { %490 = vmatprep.subr.bf16.mxu1 %v529_v7 }
  0x21   :  { %471 = vmatpush3.bf16.msra.mxu0 %v470_v63 }
  0x23   :  { %492 = vmatpush3.bf16.msra.mxu1 %v491_v25 }
  0x24   :  { %140 = vmatmul.mubr.f32.vlgmr.msra.gmra.mrb[0].mxu0 %v21_v0  ;;  %435 = vmatprep.subr.mxu1 %v531_v8 }
  0x27   :  { %436 = vmatpush3.msk.msra.mxu1 %vm245_vm3, %v234_v26 }
  0xed   :  { %v211_v1 = vpop.f32.mrb[0].mxu1 }
  0xee   :  { %v422_v2 = vpop.f32.mrb[1].mxu1 }
  0xf7   :  { %v384_v3 = vpop.f32.mrb[0].mxu0 }
  0xf8   :  { %v385_v4 = vpop.f32.mrb[1].mxu0 }
  0xf9   :  { %v386_v6 = vadd.f32 %v385_v4, %v384_v3 }
  0xfb   :  { %v142_v9 = vadd.f32 %v386_v6, %v347_v5 }
  0xfd   :  { %v212_v10 = vadd.f32 %v211_v1, %v142_v9 }
  0xff   :  { %v216_v11 = vsel %vm215_vm2, %v212_v10, -inf }
 0x100   :  { %217 = vmax.xlane.f32.xlu0 %v216_v11 }
 0x18d   :  { %v218_v12 = vpop.xlane.xlu0 %217 }
 0x18e   :  { %v219_v13 = vsub.f32 %v212_v10, %v218_v12 }
 0x190   :  { %v220_v14 = vmul.f32 1.442695, %v219_v13 }
 0x192   :  { %497 = vpow2.f32 %v220_v14 }
 0x19c   :  { %v498_v15 = vpop.eup %497 }
 0x19d   :  { %v222_v16 = vsel %vm215_vm2, %v498_v15, 0.0 }
 0x19e   :  { %223 = vadd.xlane.f32.xlu0 %v222_v16 }
 0x22b   :  { %v224_v27 = vpop.xlane.xlu0 %223 }
 0x22c   :  { %499 = vlog2.f32 %v224_v27 }
 0x236   :  { %v500_v7 = vpop.eup %499 }
 0x237   :  { %v226_v28 = vmul.f32 0.6931472, %v500_v7 }
 0x239   :  { %v227_v29 = vsub.f32 %v219_v13, %v226_v28 }
 0x23b   :  { %438 = vmatmul.mubr.msk.f32.vlgmr.msra.gmra.mrb[2].mxu1 %vm215_vm2, %v227_v29 }
 0x30e   :  { %v315_v31 = vpop.f32.mrb[2].mxu1 }
 0x30f   :  { %v316_v8 = vadd.f32 %v349_v30, %v315_v31  ;;  %v439_v32 = vpop.f32.mrb[3].mxu1 }
 0x311   :  { %v320_v33 = vsel %vm319_vm4, %v316_v8, -inf }
 0x312   :  { %321 = vmax.xlane.f32.xlu1 %v320_v33 }
 0x39f   :  { %v322_v34 = vpop.xlane.xlu1 %321 }
 0x3a0   :  { %v323_v35 = vsub.f32 %v316_v8, %v322_v34 }
 0x3a2   :  { %v324_v36 = vmul.f32 1.442695, %v323_v35 }
 0x3a4   :  { %501 = vpow2.f32 %v324_v36 }
 0x3ae   :  { %v502_v37 = vpop.eup %501 }
 0x3af   :  { %v326_v38 = vsel %vm319_vm4, %v502_v37, 0.0 }
 0x3b0   :  { %327 = vadd.xlane.f32.xlu1 %v326_v38 }
 0x43d   :  { %v328_v39 = vpop.xlane.xlu1 %327 }
 0x43e   :  { %503 = vlog2.f32 %v328_v39 }
 0x448   :  { %v504_v40 = vpop.eup %503 }
 0x449   :  { %v330_v41 = vmul.f32 0.6931472, %v504_v40 }
 0x44b   :  { %v331_v42 = vsub.f32 %v323_v35, %v330_v41 }
 0x44d   :  { %332 = vst.msk [vmem:[#allocation2] sm:$0xff] %vm319_vm4, %v331_v42 }
 0x44e   :  { %516 = shalt.err (!%p513_p4)
}
 0x44f   :  { %s517_s22 = scalar_lea.hbm %s754_s5, 128 }
 0x450   :  { %p518_p5 = scmp.ne.s32.totalorder %s754_s5, %s517_s22  ;;  %p521_p6 = scmp.lt.u32.totalorder %s517_s22, %s754_s5 }
 0x452   :  { %p523_p7 = pnand %p521_p6, %p518_p5 }
 0x454   :  { %526 = shalt.err (!%p523_p7)
}
 0x455   :  { %342 = dma.vmem_to_hbm [thread:$0]  %s340_s4, 128, %s754_s5, [#allocation3]  }
 0x456   :  { %527 = dma.done.wait [#allocation3], 128  }
 0x457   :  { %528 = vsyncadd [#allocation3], 4294967168 }
 0x458   :  { %346 = vsyncpa [#allocation3], 1 }

</bundles_post_ra>
